<compile_context>
chip_gen: v5e
topology: v5e:2x2
jax: 0.10.0
libtpu: 0.0.40
codegen_flags: <defaults>
</compile_context>

<pallas_src>
import functools
import math

import jax
import jax.numpy as jnp
from jax import lax
from jax.experimental import pallas as pl
from jax.experimental.pallas import tpu as pltpu

PI = math.pi


def _round_up(a: int, b: int) -> int:
    return ((a + b - 1) // b) * b


def _dice_kernel(x_ref, r_ref, q_ref, o_ref, *, x_min, x_max, d, d_pad):
    # x_ref: (TN, 1) f32, r_ref: (TN, 1) f32 uniform(-pi, pi),
    # q_ref: (d_pad, d_pad) f32, o_ref: (TN, d_pad) f32
    x = x_ref[...]
    rand = r_ref[...]
    tn = x.shape[0]

    # normalize to [0, 1]; out-of-range values fall back to uniform(-pi, pi)
    xn = (x - x_min) * (1.0 / (x_max - x_min))
    valid = (xn >= 0.0) & (xn <= 1.0)
    ang = jnp.where(valid, xn * PI, rand)
    c = jnp.cos(ang)                      # (TN, 1)
    s = jnp.sin(ang)                      # (TN, 1)

    # column index j = 0 .. d_pad-1
    e_i = lax.broadcasted_iota(jnp.int32, (tn, d_pad), 1)

    # feat[i, j] = cos(ang_i) * sin(ang_i)^j   for j < d-1
    #            = sin(ang_i)^(d-1)            for j == d-1
    # (columns j >= d are finite don't-cares: Q rows >= d are zero.)
    # sin^j via binary exponentiation: ~log2(d) VPU mul/selects, no exp/log.
    feat = jnp.where(e_i < d - 1, c, 1.0)      # cos factor (broadcast (TN,1))
    nbits = max(1, (d - 1).bit_length())
    sq = s                                     # s^(2^b)
    for b in range(nbits):
        feat = feat * jnp.where(((e_i >> b) & 1) == 1, sq, 1.0)
        if b + 1 < nbits:
            sq = sq * sq

    # (TN, d_pad) @ (d_pad, d_pad) on the MXU, lane-dense output
    o_ref[...] = jnp.dot(feat, q_ref[...], preferred_element_type=jnp.float32)


def dice_forward(x, Q, *, x_min, x_max, seed=0):
    assert x.ndim == 1
    n = x.shape[0]
    d = Q.shape[0]

    d_pad = _round_up(max(d, 128), 128)        # lane-dense output / MXU N-dim
    TN = min(512, _round_up(max(n, 8), 8))     # row tile (multiple of 8)
    n_pad = _round_up(n, TN)

    # pad x with x_min (in-range) so padded rows take the deterministic branch
    x2 = jnp.full((n_pad, 1), float(x_min), dtype=jnp.float32)
    x2 = x2.at[:n, 0].set(x.astype(jnp.float32))

    # uniform(-pi, pi) fallback (mirrors torch.empty_like(x).uniform_(-pi, pi));
    # generated host-side instead of with the on-chip PRNG.
    rand = jax.random.uniform(
        jax.random.PRNGKey(seed), (n_pad, 1),
        minval=-PI, maxval=PI, dtype=jnp.float32)

    Q_pad = jnp.zeros((d_pad, d_pad), jnp.float32)
    Q_pad = Q_pad.at[:d, :d].set(Q.astype(jnp.float32))

    kernel = functools.partial(
        _dice_kernel, x_min=float(x_min), x_max=float(x_max), d=d, d_pad=d_pad)

    out = pl.pallas_call(
        kernel,
        out_shape=jax.ShapeDtypeStruct((n_pad, d_pad), jnp.float32),
        grid_spec=pltpu.PrefetchScalarGridSpec(
            num_scalar_prefetch=0,
            grid=(n_pad // TN,),
            in_specs=[
                pl.BlockSpec((TN, 1), lambda i: (i, 0)),          # x tile
                pl.BlockSpec((TN, 1), lambda i: (i, 0)),          # rand tile
                pl.BlockSpec((d_pad, d_pad), lambda i: (0, 0)),   # Q resident
            ],
            out_specs=pl.BlockSpec((TN, d_pad), lambda i: (i, 0)),
        ),
        compiler_params=pltpu.CompilerParams(
            dimension_semantics=("parallel",),
        ),
    )(x2, rand, Q_pad)

    return out[:n, :d]


def dice_reference(x, Q, *, x_min, x_max):
    # pure-JAX reference for the in-range (deterministic) path
    xn = (x - x_min) / (x_max - x_min)
    ang = xn * jnp.pi
    d = Q.shape[0]
    exps = jnp.arange(d - 1, dtype=x.dtype)
    feat = jnp.concatenate(
        [
            jnp.cos(ang)[:, None] * jnp.sin(ang)[:, None] ** exps[None],
            (jnp.sin(ang) ** (d - 1))[:, None],
        ],
        axis=1,
    )
    return feat @ Q


if __name__ == "__main__":
    n, d = 16, 32
    x_min, x_max = -2.0, 3.0

    key = jax.random.PRNGKey(0)
    k_m, k_x = jax.random.split(key)

    # deterministic parameter init: Q = orthogonal factor of a random matrix
    M = jax.random.normal(k_m, (d, d), dtype=jnp.float32)
    Q, _ = jnp.linalg.qr(M)

    # inputs inside [x_min, x_max] -> deterministic (non-random) branch
    x = jax.random.uniform(k_x, (n,), minval=x_min, maxval=x_max, dtype=jnp.float32)

    out = dice_forward(x, Q, x_min=x_min, x_max=x_max, seed=0)
    out = jax.block_until_ready(out)

    ref = dice_reference(x, Q, x_min=x_min, x_max=x_max)
    assert out.shape == (n, d)
    assert jnp.allclose(out, ref, atol=1e-4, rtol=1e-4), (
        float(jnp.max(jnp.abs(out - ref)))
    )
    print("KERNEL_OK")
</pallas_src>

<mosaic_0001>
module attributes {stable_mosaic.version = 11 : i64} {
  func.func @_dice_kernel(%arg0: i32, %arg1: memref<16x1xf32, #tpu.memory_space<vmem>>, %arg2: memref<16x1xf32, #tpu.memory_space<vmem>>, %arg3: memref<128x128xf32, #tpu.memory_space<vmem>>, %arg4: memref<16x128xf32, #tpu.memory_space<vmem>>) attributes {dimension_semantics = [#tpu.dimension_semantics<parallel>], iteration_bounds = array<i64: 1>, scalar_prefetch = 0 : i64, scratch_operands = 0 : i64, tpu.core_type = #tpu.core_type<tc>, window_params = [{transform_indices = @transform_0, window_bounds = array<i64: 16, 1>}, {transform_indices = @transform_1, window_bounds = array<i64: 16, 1>}, {pipeline_mode = #tpu.pipeline_mode<synchronous>, transform_indices = @transform_2, window_bounds = array<i64: 128, 128>}, {transform_indices = @transform_3, window_bounds = array<i64: 16, 128>}]} {
    %c0 = arith.constant 0 : index
    %c0_0 = arith.constant 0 : index
    %0 = vector.load %arg1[%c0, %c0_0] : memref<16x1xf32, #tpu.memory_space<vmem>>, vector<16x1xf32>
    %c0_1 = arith.constant 0 : index
    %c0_2 = arith.constant 0 : index
    %1 = vector.load %arg2[%c0_1, %c0_2] : memref<16x1xf32, #tpu.memory_space<vmem>>, vector<16x1xf32>
    %cst = arith.constant -2.000000e+00 : f32
    %2 = vector.broadcast %cst : f32 to vector<16x1xf32>
    %3 = arith.subf %0, %2 : vector<16x1xf32>
    %cst_3 = arith.constant 2.000000e-01 : f32
    %4 = vector.broadcast %cst_3 : f32 to vector<16x1xf32>
    %5 = arith.mulf %3, %4 : vector<16x1xf32>
    %cst_4 = arith.constant 0.000000e+00 : f32
    %6 = vector.broadcast %cst_4 : f32 to vector<16x1xf32>
    %7 = arith.cmpf oge, %5, %6 : vector<16x1xf32>
    %cst_5 = arith.constant 1.000000e+00 : f32
    %8 = vector.broadcast %cst_5 : f32 to vector<16x1xf32>
    %9 = arith.cmpf ole, %5, %8 : vector<16x1xf32>
    %10 = arith.andi %7, %9 : vector<16x1xi1>
    %cst_6 = arith.constant 3.14159274 : f32
    %11 = vector.broadcast %cst_6 : f32 to vector<16x1xf32>
    %12 = arith.mulf %5, %11 : vector<16x1xf32>
    %13 = arith.select %10, %12, %1 : vector<16x1xi1>, vector<16x1xf32>
    %14 = math.cos %13 : vector<16x1xf32>
    %15 = math.sin %13 : vector<16x1xf32>
    %16 = tpu.iota {dimensions = array<i32: 1>} : vector<16x128xi32>
    %c31_i32 = arith.constant 31 : i32
    %17 = vector.broadcast %c31_i32 : i32 to vector<16x128xi32>
    %18 = arith.cmpi slt, %16, %17 : vector<16x128xi32>
    %cst_7 = arith.constant 1.000000e+00 : f32
    %19 = vector.shape_cast %14 : vector<16x1xf32> to vector<16x1xf32>
    %20 = vector.broadcast %19 : vector<16x1xf32> to vector<16x128xf32>
    %21 = vector.broadcast %cst_7 : f32 to vector<16x128xf32>
    %22 = arith.select %18, %20, %21 : vector<16x128xi1>, vector<16x128xf32>
    %c0_i32 = arith.constant 0 : i32
    %23 = vector.broadcast %c0_i32 : i32 to vector<16x128xi32>
    %24 = arith.shrsi %16, %23 : vector<16x128xi32>
    %c1_i32 = arith.constant 1 : i32
    %25 = vector.broadcast %c1_i32 : i32 to vector<16x128xi32>
    %26 = arith.andi %24, %25 : vector<16x128xi32>
    %c1_i32_8 = arith.constant 1 : i32
    %27 = vector.broadcast %c1_i32_8 : i32 to vector<16x128xi32>
    %28 = arith.cmpi eq, %26, %27 : vector<16x128xi32>
    %cst_9 = arith.constant 1.000000e+00 : f32
    %29 = vector.shape_cast %15 : vector<16x1xf32> to vector<16x1xf32>
    %30 = vector.broadcast %29 : vector<16x1xf32> to vector<16x128xf32>
    %31 = vector.broadcast %cst_9 : f32 to vector<16x128xf32>
    %32 = arith.select %28, %30, %31 : vector<16x128xi1>, vector<16x128xf32>
    %33 = arith.mulf %22, %32 : vector<16x128xf32>
    %34 = arith.mulf %15, %15 : vector<16x1xf32>
    %c1_i32_10 = arith.constant 1 : i32
    %35 = vector.broadcast %c1_i32_10 : i32 to vector<16x128xi32>
    %36 = arith.shrsi %16, %35 : vector<16x128xi32>
    %c1_i32_11 = arith.constant 1 : i32
    %37 = vector.broadcast %c1_i32_11 : i32 to vector<16x128xi32>
    %38 = arith.andi %36, %37 : vector<16x128xi32>
    %c1_i32_12 = arith.constant 1 : i32
    %39 = vector.broadcast %c1_i32_12 : i32 to vector<16x128xi32>
    %40 = arith.cmpi eq, %38, %39 : vector<16x128xi32>
    %cst_13 = arith.constant 1.000000e+00 : f32
    %41 = vector.shape_cast %34 : vector<16x1xf32> to vector<16x1xf32>
    %42 = vector.broadcast %41 : vector<16x1xf32> to vector<16x128xf32>
    %43 = vector.broadcast %cst_13 : f32 to vector<16x128xf32>
    %44 = arith.select %40, %42, %43 : vector<16x128xi1>, vector<16x128xf32>
    %45 = arith.mulf %33, %44 : vector<16x128xf32>
    %46 = arith.mulf %34, %34 : vector<16x1xf32>
    %c2_i32 = arith.constant 2 : i32
    %47 = vector.broadcast %c2_i32 : i32 to vector<16x128xi32>
    %48 = arith.shrsi %16, %47 : vector<16x128xi32>
    %c1_i32_14 = arith.constant 1 : i32
    %49 = vector.broadcast %c1_i32_14 : i32 to vector<16x128xi32>
    %50 = arith.andi %48, %49 : vector<16x128xi32>
    %c1_i32_15 = arith.constant 1 : i32
    %51 = vector.broadcast %c1_i32_15 : i32 to vector<16x128xi32>
    %52 = arith.cmpi eq, %50, %51 : vector<16x128xi32>
    %cst_16 = arith.constant 1.000000e+00 : f32
    %53 = vector.shape_cast %46 : vector<16x1xf32> to vector<16x1xf32>
    %54 = vector.broadcast %53 : vector<16x1xf32> to vector<16x128xf32>
    %55 = vector.broadcast %cst_16 : f32 to vector<16x128xf32>
    %56 = arith.select %52, %54, %55 : vector<16x128xi1>, vector<16x128xf32>
    %57 = arith.mulf %45, %56 : vector<16x128xf32>
    %58 = arith.mulf %46, %46 : vector<16x1xf32>
    %c3_i32 = arith.constant 3 : i32
    %59 = vector.broadcast %c3_i32 : i32 to vector<16x128xi32>
    %60 = arith.shrsi %16, %59 : vector<16x128xi32>
    %c1_i32_17 = arith.constant 1 : i32
    %61 = vector.broadcast %c1_i32_17 : i32 to vector<16x128xi32>
    %62 = arith.andi %60, %61 : vector<16x128xi32>
    %c1_i32_18 = arith.constant 1 : i32
    %63 = vector.broadcast %c1_i32_18 : i32 to vector<16x128xi32>
    %64 = arith.cmpi eq, %62, %63 : vector<16x128xi32>
    %cst_19 = arith.constant 1.000000e+00 : f32
    %65 = vector.shape_cast %58 : vector<16x1xf32> to vector<16x1xf32>
    %66 = vector.broadcast %65 : vector<16x1xf32> to vector<16x128xf32>
    %67 = vector.broadcast %cst_19 : f32 to vector<16x128xf32>
    %68 = arith.select %64, %66, %67 : vector<16x128xi1>, vector<16x128xf32>
    %69 = arith.mulf %57, %68 : vector<16x128xf32>
    %70 = arith.mulf %58, %58 : vector<16x1xf32>
    %c4_i32 = arith.constant 4 : i32
    %71 = vector.broadcast %c4_i32 : i32 to vector<16x128xi32>
    %72 = arith.shrsi %16, %71 : vector<16x128xi32>
    %c1_i32_20 = arith.constant 1 : i32
    %73 = vector.broadcast %c1_i32_20 : i32 to vector<16x128xi32>
    %74 = arith.andi %72, %73 : vector<16x128xi32>
    %c1_i32_21 = arith.constant 1 : i32
    %75 = vector.broadcast %c1_i32_21 : i32 to vector<16x128xi32>
    %76 = arith.cmpi eq, %74, %75 : vector<16x128xi32>
    %cst_22 = arith.constant 1.000000e+00 : f32
    %77 = vector.shape_cast %70 : vector<16x1xf32> to vector<16x1xf32>
    %78 = vector.broadcast %77 : vector<16x1xf32> to vector<16x128xf32>
    %79 = vector.broadcast %cst_22 : f32 to vector<16x128xf32>
    %80 = arith.select %76, %78, %79 : vector<16x128xi1>, vector<16x128xf32>
    %81 = arith.mulf %69, %80 : vector<16x128xf32>
    %c0_23 = arith.constant 0 : index
    %c0_24 = arith.constant 0 : index
    %82 = vector.load %arg3[%c0_23, %c0_24] : memref<128x128xf32, #tpu.memory_space<vmem>>, vector<128x128xf32>
    %cst_25 = arith.constant dense<0.000000e+00> : vector<16x128xf32>
    %83 = tpu.matmul %81, %82, %cst_25 {dimension_numbers = #tpu.dot_dimension_numbers<[1], [0], [0], [1], [0, 0, 1, 1], [], []>} : vector<16x128xf32>, vector<128x128xf32>, vector<16x128xf32> -> vector<16x128xf32>
    %c0_26 = arith.constant 0 : index
    %c0_27 = arith.constant 0 : index
    %84 = vector.load %arg4[%c0_26, %c0_27] : memref<16x128xf32, #tpu.memory_space<vmem>>, vector<16x128xf32>
    tpu.vector_store %arg4[%c0_26, %c0_27], %83 {strides = array<i32>} : memref<16x128xf32, #tpu.memory_space<vmem>>, vector<16x128xf32>,
    return
  }
  func.func @transform_0(%arg0: i32) -> (i32, i32) {
    %c0_i32 = arith.constant 0 : i32
    %c0_i32_0 = arith.constant 0 : i32
    return %arg0, %c0_i32 : i32, i32
  }
  func.func @transform_1(%arg0: i32) -> (i32, i32) {
    %c0_i32 = arith.constant 0 : i32
    %c0_i32_0 = arith.constant 0 : i32
    return %arg0, %c0_i32 : i32, i32
  }
  func.func @transform_2(%arg0: i32) -> (i32, i32) {
    %c0_i32 = arith.constant 0 : i32
    %c0_i32_0 = arith.constant 0 : i32
    %c0_i32_1 = arith.constant 0 : i32
    return %c0_i32, %c0_i32_0 : i32, i32
  }
  func.func @transform_3(%arg0: i32) -> (i32, i32) {
    %c0_i32 = arith.constant 0 : i32
    %c0_i32_0 = arith.constant 0 : i32
    return %arg0, %c0_i32 : i32, i32
  }
}

</mosaic_0001>

<bundles_post_ra>
// kernel: tpu_custom_call.1
= control target key start
LH: loop header
LB: loop body
LE: loop exit
PB: predicated region body
PF: predicated region fallthrough
CT: control target
= control target key end

     0   :  { %8 = vsyncpa [#allocation3], 0  ;;  %s1167_s0 = inlined_call_operand.vmem [shape: f32[16,1], index: 0, kind: input, shape index: {}]   ;;  %s1168_s1 = inlined_call_operand.vmem [shape: f32[16,1], index: 1, kind: input, shape index: {}]   ;;  %s1169_s2 = inlined_call_operand.hbm [shape: f32[128,128], index: 2, kind: input, shape index: {}]   ;;  %s1170_s3 = inlined_call_operand.hbm [shape: f32[16,128], index: 3, kind: output, shape index: {}]  }
   0x1   :  { %9 = vsyncpa [#allocation4], 0  ;;  %s18_s14 = sshll.u32 %s1169_s2, 4  ;;  %s930_s15 = smov [#allocation2]   ;;  %s19_s14 = int_to_ptr.hbm [resolvable:$true] %s18_s14 }
   0x2   :  { %s20_s16 = sshll.u32 %s930_s15, 4  ;;  %s931_s17 = smov 128   ;;  %s21_s16 = int_to_ptr.vmem [resolvable:$true] %s20_s16 }
   0x3   :  { %s932_s18 = smov 8  }
   0x4   :  { %26 = dma.hbm_to_vmem [thread:$0]  %s19_s14, 2048, %s21_s16, [#allocation3], %s931_s17, %s931_s17, %s932_s18  }
   0x5   :  { %926 = dma.done.wait [#allocation3], 2048  }
   0x6   :  { %927 = vsyncadd [#allocation3], 4294965248  ;;  %v933_v0 = vmov 0   ;;  %v31_v1 = vld [vmem:[%s1167_s0] sm:$0xff]  ;;  %v32_v2 = vld [vmem:[%s1167_s0 + $0x8] sm:$0xff]  ;;  %s940_s0 = smov [#allocation5]  }
   0x7   :  { %876 = vset.pattern.permute.xlu1 %v933_v0  ;;  %875 = vset.pattern.permute.xlu0 %v933_v0  ;;  %v834_v3 = vadd.f32 2.0, %v31_v1  ;;  %v835_v4 = vadd.f32 2.0, %v32_v2  ;;  %v33_v7 = vld [vmem:[%s1168_s1] sm:$0xff]  ;;  %v34_v9 = vld [vmem:[%s1168_s1 + $0x8] sm:$0xff]  ;;  %v934_v34 = vmov 683565275  }
   0x8   :  { %877 = vset.pattern.permute.xlu2 %v933_v0  ;;  %v935_v36 = vmov 2475754826   ;;  %v936_v38 = vmov 2131351028   ;;  %v937_v40 = vmov 2102212464  }
   0x9   :  { %v37_v5 = vmul.f32 0.2, %v834_v3  ;;  %v38_v6 = vmul.f32 0.2, %v835_v4  ;;  %v938_v42 = vmov 920167782  }
   0xa   :  { %v939_v51 = vmov 1326507024   ;;  %s819_s1 = sshll.u32 %s940_s0, 4  ;;  %s821_s28 = sshll.u32 %s1170_s3, 4  ;;  %s820_s1 = int_to_ptr.vmem [resolvable:$true] %s819_s1  ;;  %s822_s28 = int_to_ptr.hbm [resolvable:$true] %s821_s28 }
   0xb   :  { %vm39_vm0 = vcmp.ge.f32.partialorder %v37_v5, 0.0  ;;  %vm41_vm1 = vcmp.le.f32.partialorder %v37_v5, 1.0  ;;  %v45_v8 = vmul.f32 3.1415927, %v37_v5  ;;  %vm40_vm2 = vcmp.ge.f32.partialorder %v38_v6, 0.0 }
   0xc   :  { %vm43_vm3 = vmand %vm39_vm0, %vm41_vm1  ;;  %vm42_vm4 = vcmp.le.f32.partialorder %v38_v6, 1.0  ;;  %v46_v10 = vmul.f32 3.1415927, %v38_v6 }
   0xd   :  { %v982_v11 = vsel %vm43_vm3, %v45_v8, %v33_v7  ;;  %vm44_vm5 = vmand %vm40_vm2, %vm42_vm4 }
   0xe   :  { %v49_v12 = vand.u32 2147483647, %v982_v11  ;;  %v52_v13 = vand.u32 2139095040, %v982_v11  ;;  %v986_v14 = vsel %vm44_vm5, %v46_v10, %v34_v9 }
   0xf   :  { %v203_v15 = vand.u32 2147483647, %v986_v14  ;;  %v206_v16 = vand.u32 2139095040, %v986_v14 }
  0x10   :  { %v53_v17 = vshrl.u32 %v52_v13, 23  ;;  %v56_v18 = vand.u32 8388607, %v49_v12 }
  0x11   :  { %v207_v19 = vshrl.u32 %v206_v16, 23  ;;  %v210_v23 = vand.u32 8388607, %v203_v15 }
  0x12   :  { %v836_v20 = vadd.s32 4294967169, %v53_v17  ;;  %v57_v21 = vor.u32 8388608, %v56_v18 }
  0x13   :  { %v839_v22 = vadd.s32 4294967169, %v207_v19  ;;  %v211_v28 = vor.u32 8388608, %v210_v23 }
  0x14   :  { %v59_v24 = vadd.s32 1, %v836_v20  ;;  %v994_v27 = vshll.u32 %v57_v21, 8 }
  0x15   :  { %v213_v25 = vadd.s32 1, %v839_v22  ;;  %v1004_v45 = vshll.u32 %v211_v28, 8 }
  0x16   :  { %vm60_vm6 = vcmp.gt.s32.totalorder %v59_v24, 0  ;;  %v98_v44 = vand.u32 65535, %v994_v27  ;;  %v99_v49 = vshrl.u32 %v994_v27, 16 }
  0x17   :  { %v61_v26 = vsel %vm60_vm6, %v59_v24, 0  ;;  %vm214_vm7 = vcmp.gt.s32.totalorder %v213_v25, 0 }
  0x18   :  { %v63_v29 = vand.u32 31, %v61_v26  ;;  %v215_v30 = vsel %vm214_vm7, %v213_v25, 0  ;;  %v996_v31 = vshrl.u32 %v61_v26, 5 }
  0x19   :  { %v998_v32 = vand.u32 31, %v215_v30  ;;  %v1022_v62 = vshrl.u32 %v215_v30, 5 }
  0x1a   :  { %v64_v33 = vsub.s32 32, %v63_v29  ;;  %v66_v35 = vshll.u32 %v934_v34, %v63_v29  ;;  %v69_v37 = vshll.u32 %v935_v36, %v63_v29  ;;  %v72_v39 = vshll.u32 %v936_v38, %v63_v29 }
  0x1b   :  { %v75_v41 = vshll.u32 %v937_v40, %v63_v29  ;;  %v78_v43 = vshll.u32 %v938_v42, %v63_v29  ;;  %vm81_vm8 = vcmp.lt.s32.totalorder %v996_v31, 1  ;;  %vm84_vm9 = vcmp.lt.s32.totalorder %v996_v31, 4 }
  0x1c   :  { %v67_v46 = vshrl.u32 %v935_v36, %v64_v33  ;;  %v70_v47 = vshrl.u32 %v936_v38, %v64_v33  ;;  %v73_v48 = vshrl.u32 %v937_v40, %v64_v33  ;;  %v76_v50 = vshrl.u32 %v938_v42, %v64_v33 }
  0x1d   :  { %v79_v52 = vshrl.u32 %v939_v51, %v64_v33  ;;  %v1013_v56 = vsub.s32 32, %v998_v32  ;;  %v65_v57 = vshrl.u32 %v934_v34, %v64_v33  ;;  %vm83_vm10 = vcmp.lt.s32.totalorder %v996_v31, 3 }
  0x1e   :  { %v68_v53 = vor.u32 %v67_v46, %v66_v35  ;;  %v71_v54 = vor.u32 %v70_v47, %v69_v37  ;;  %v74_v55 = vor.u32 %v73_v48, %v72_v39  ;;  %v77_v58 = vor.u32 %v76_v50, %v75_v41 }
  0x1f   :  { %v80_v59 = vor.u32 %v79_v52, %v78_v43  ;;  %vm82_vm11 = vcmp.lt.s32.totalorder %v996_v31, 2  ;;  %v220_v2 = vshll.u32 %v934_v34, %v998_v32  ;;  %v223_v3 = vshll.u32 %v935_v36, %v998_v32 }
  0x20   :  { %v89_v60 = vsel %vm81_vm8, %v68_v53, %v71_v54  ;;  %v93_v61 = vsel %vm81_vm8, %v71_v54, %v74_v55  ;;  %v90_v63 = vsel %vm84_vm9, %v77_v58, 920167782  ;;  %v86_v4 = vsel %vm84_vm9, %v74_v55, 2102212464 }
  0x21   :  { %v94_v1 = vsel %vm84_vm9, %v80_v59, 1326507024  ;;  %v91_v5 = vsel %vm83_vm10, %v74_v55, %v90_v63  ;;  %v221_v7 = vshrl.u32 %v935_v36, %v1013_v56  ;;  %v85_v8 = vsel %vm81_vm8, %v65_v57, %v68_v53 }
  0x22   :  { %v95_v6 = vsel %vm83_vm10, %v77_v58, %v94_v1  ;;  %v92_v9 = vsel %vm82_vm11, %v89_v60, %v91_v5  ;;  %v224_v13 = vshrl.u32 %v936_v38, %v1013_v56  ;;  %v87_v20 = vsel %vm83_vm10, %v71_v54, %v86_v4 }
  0x23   :  { %v96_v10 = vsel %vm82_vm11, %v93_v61, %v95_v6  ;;  %v122_v18 = vand.u32 65535, %v92_v9  ;;  %v123_v19 = vshrl.u32 %v92_v9, 16  ;;  %v1047_v21 = vor.u32 %v221_v7, %v220_v2 }
  0x24   :  { %v100_v16 = vand.u32 65535, %v96_v10  ;;  %v101_v17 = vshrl.u32 %v96_v10, 16  ;;  %v1049_v22 = vor.u32 %v224_v13, %v223_v3  ;;  %v226_v23 = vshll.u32 %v936_v38, %v998_v32 }
  0x25   :  { %v227_v28 = vshrl.u32 %v937_v40, %v1013_v56  ;;  %v124_v30 = vmul.u32 %v122_v18, %v98_v44  ;;  %v125_v33 = vmul.u32 %v123_v19, %v98_v44  ;;  %v126_v35 = vmul.u32 %v122_v18, %v99_v49 }
  0x26   :  { %v102_v24 = vmul.u32 %v100_v16, %v98_v44  ;;  %v103_v25 = vmul.u32 %v101_v17, %v98_v44  ;;  %v104_v26 = vmul.u32 %v100_v16, %v99_v49  ;;  %v105_v29 = vmul.u32 %v101_v17, %v99_v49 }
  0x27   :  { %v127_v41 = vmul.u32 %v123_v19, %v99_v49  ;;  %v128_v46 = vshll.u32 %v125_v33, 16  ;;  %v129_v47 = vshrl.u32 %v125_v33, 16  ;;  %v130_v48 = vshll.u32 %v126_v35, 16 }
  0x28   :  { %v106_v36 = vshll.u32 %v103_v25, 16  ;;  %v107_v37 = vshrl.u32 %v103_v25, 16  ;;  %v108_v39 = vshll.u32 %v104_v26, 16  ;;  %v109_v43 = vshrl.u32 %v104_v26, 16 }
  0x29   :  { %v131_v50 = vshrl.u32 %v126_v35, 16  ;;  %v229_v52 = vshll.u32 %v937_v40, %v998_v32  ;;  %vm132_vm13 = vc.u32 %v124_v30, %v128_v46  ;;  %v134_v54 = vadd.s32 %v128_v46, %v124_v30 }
  0x2a   :  { %vm110_vm12 = vc.u32 %v102_v24, %v106_v36  ;;  %v112_v38 = vadd.s32 %v106_v36, %v102_v24  ;;  %v230_v44 = vshrl.u32 %v938_v42, %v1013_v56  ;;  %v133_v49 = vsel %vm132_vm13, 1, %v933_v0 }
  0x2b   :  { %v111_v53 = vsel %vm110_vm12, 1, %v933_v0  ;;  %v232_v57 = vshll.u32 %v938_v42, %v998_v32  ;;  %v135_v59 = vadd.s32 %v133_v49, %v127_v41  ;;  %vm136_vm15 = vc.u32 %v134_v54, %v130_v48 }
  0x2c   :  { %v113_v55 = vadd.s32 %v111_v53, %v105_v29  ;;  %vm114_vm14 = vc.u32 %v112_v38, %v108_v39  ;;  %v228_v60 = vor.u32 %v227_v28, %v226_v23  ;;  %v137_v61 = vsel %vm136_vm15, 1, %v933_v0 }
  0x2d   :  { %v115_v58 = vsel %vm114_vm14, 1, %v933_v0  ;;  %v231_v63 = vor.u32 %v230_v44, %v229_v52  ;;  %v233_v1 = vshrl.u32 %v939_v51, %v1013_v56  ;;  %v1066_v2 = vadd.s32 %v134_v54, %v130_v48 }
  0x2e   :  { %v117_v40 = vadd.s32 %v115_v58, %v113_v55  ;;  %v139_v3 = vadd.s32 %v137_v61, %v135_v59  ;;  %vm235_vm0 = vcmp.lt.s32.totalorder %v1022_v62, 1  ;;  %vm237_vm1 = vcmp.lt.s32.totalorder %v1022_v62, 3 }
  0x2f   :  { %v234_v42 = vor.u32 %v233_v1, %v232_v57  ;;  %vm236_vm2 = vcmp.lt.s32.totalorder %v1022_v62, 2  ;;  %vm238_vm3 = vcmp.lt.s32.totalorder %v1022_v62, 4  ;;  %v88_v4 = vsel %vm82_vm11, %v85_v8, %v87_v20 }
  0x30   :  { %v118_v32 = vadd.s32 %v117_v40, %v107_v37  ;;  %v140_v5 = vadd.s32 %v139_v3, %v129_v47  ;;  %v243_v51 = vsel %vm235_vm0, %v1047_v21, %v1049_v22  ;;  %v244_v6 = vsel %vm238_vm3, %v231_v63, 920167782 }
  0x31   :  { %v245_v9 = vsel %vm237_vm1, %v228_v60, %v244_v6  ;;  %v247_v10 = vsel %vm235_vm0, %v1049_v22, %v228_v60  ;;  %v253_v31 = vshrl.u32 %v1004_v45, 16  ;;  %v248_v16 = vsel %vm238_vm3, %v234_v42, 1326507024 }
  0x32   :  { %v1080_v7 = vadd.s32 %v118_v32, %v109_v43  ;;  %v141_v8 = vadd.s32 %v140_v5, %v131_v50  ;;  %v246_v13 = vsel %vm236_vm2, %v243_v51, %v245_v9  ;;  %v252_v17 = vand.u32 65535, %v1004_v45 }
  0x33   :  { %v142_v18 = vmul.u32 %v994_v27, %v88_v4  ;;  %v249_v19 = vsel %vm237_vm1, %v231_v63, %v248_v16  ;;  %v276_v20 = vand.u32 65535, %v246_v13  ;;  %v277_v25 = vshrl.u32 %v246_v13, 16 }
  0x34   :  { %vm144_vm4 = vc.u32 %v1080_v7, %v1066_v2  ;;  %v145_v23 = vadd.s32 1, %v141_v8  ;;  %v250_v24 = vsel %vm236_vm2, %v247_v10, %v249_v19  ;;  %v219_v52 = vshrl.u32 %v934_v34, %v1013_v56 }
  0x35   :  { %v254_v26 = vand.u32 65535, %v250_v24  ;;  %v255_v28 = vshrl.u32 %v250_v24, 16  ;;  %v280_v29 = vmul.u32 %v276_v20, %v253_v31  ;;  %v278_v33 = vmul.u32 %v276_v20, %v252_v17 }
  0x36   :  { %v146_v30 = vsel %vm144_vm4, %v145_v23, %v141_v8  ;;  %v279_v35 = vmul.u32 %v277_v25, %v252_v17  ;;  %v281_v41 = vmul.u32 %v277_v25, %v253_v31  ;;  %v240_v49 = vsel %vm238_vm3, %v228_v60, 2102212464 }
  0x37   :  { %v147_v36 = vadd.s32 %v146_v30, %v142_v18  ;;  %v256_v27 = vmul.u32 %v254_v26, %v252_v17  ;;  %v257_v37 = vmul.u32 %v255_v28, %v252_v17  ;;  %v258_v39 = vmul.u32 %v254_v26, %v253_v31 }
  0x38   :  { %v282_v43 = vshll.u32 %v279_v35, 16  ;;  %v284_v46 = vshll.u32 %v280_v29, 16  ;;  %v259_v48 = vmul.u32 %v255_v28, %v253_v31  ;;  %v239_v34 = vsel %vm235_vm0, %v219_v52, %v1047_v21 }
  0x39   :  { %v148_v47 = vadd.s32 536870912, %v147_v36  ;;  %v260_v38 = vshll.u32 %v257_v37, 16  ;;  %v262_v50 = vshll.u32 %v258_v39, 16  ;;  %v261_v40 = vshrl.u32 %v257_v37, 16 }
  0x3a   :  { %vm286_vm5 = vc.u32 %v278_v33, %v282_v43  ;;  %v288_v53 = vadd.s32 %v282_v43, %v278_v33  ;;  %v283_v63 = vshrl.u32 %v279_v35, 16  ;;  %v241_v60 = vsel %vm237_vm1, %v1049_v22, %v240_v49 }
  0x3b   :  { %v1102_v54 = vshrl.u32 %v148_v47, 30  ;;  %vm264_vm6 = vc.u32 %v256_v27, %v260_v38  ;;  %v266_v44 = vadd.s32 %v260_v38, %v256_v27  ;;  %v287_v55 = vsel %vm286_vm5, 1, %v933_v0 }
  0x3c   :  { %v265_v57 = vsel %vm264_vm6, 1, %v933_v0  ;;  %v289_v58 = vadd.s32 %v287_v55, %v281_v41  ;;  %vm290_vm7 = vc.u32 %v288_v53, %v284_v46  ;;  %v263_v32 = vshrl.u32 %v258_v39, 16 }
  0x3d   :  { %v150_v59 = vshll.u32 %v1102_v54, 30  ;;  %v267_v61 = vadd.s32 %v265_v57, %v259_v48  ;;  %vm268_vm8 = vc.u32 %v266_v44, %v262_v50  ;;  %v291_v1 = vsel %vm290_vm7, 1, %v933_v0 }
  0x3e   :  { %v269_v56 = vsel %vm268_vm8, 1, %v933_v0  ;;  %v285_v4 = vshrl.u32 %v280_v29, 16  ;;  %v293_v5 = vadd.s32 %v291_v1, %v289_v58  ;;  %v292_v9 = vadd.s32 %v288_v53, %v284_v46 }
  0x3f   :  { %v151_v3 = vsub.s32 %v147_v36, %v150_v59  ;;  %v271_v42 = vadd.s32 %v269_v56, %v267_v61  ;;  %v242_v21 = vsel %vm236_vm2, %v239_v34, %v241_v60  ;;  %v143_v18 = vadd.s32 %v1066_v2, %v1080_v7 }
  0x40   :  { %v294_v10 = vadd.s32 %v293_v5, %v283_v63  ;;  %v296_v16 = vmul.u32 %v1004_v45, %v242_v21  ;;  %v173_v39 = vsub.s32 4, %v1102_v54  ;;  %vm51_vm12 = vcmp.lt.s32.totalorder %v982_v11, 0 }
  0x41   :  { %vm152_vm9 = vcmp.lt.s32.totalorder %v151_v3, 0  ;;  %v153_v51 = vsub.s32 0, %v151_v3  ;;  %v272_v6 = vadd.s32 %v271_v42, %v261_v40  ;;  %vm50_vm14 = vcmp.le.f32.partialorder %v49_v12, 0.7853982 }
  0x42   :  { %v295_v13 = vadd.s32 %v294_v10, %v285_v4  ;;  %v174_v48 = vsel %vm51_vm12, %v173_v39, %v1102_v54  ;;  %vm205_vm3 = vcmp.lt.s32.totalorder %v986_v14, 0  ;;  %vm192_vm7 = vweird.f32 %v982_v11 }
  0x43   :  { %v154_v31 = vsel %vm152_vm9, %v153_v51, %v151_v3  ;;  %v273_v8 = vadd.s32 %v272_v6, %v263_v32  ;;  %v176_v44 = vsel %vm50_vm14, 0, %v174_v48  ;;  %vm1136_vm8 = vcmp.le.f32.partialorder %v203_v15, 0.7853982 }
  0x44   :  { %v155_v0 = vclz %v154_v31  ;;  %v299_v17 = vadd.s32 1, %v295_v13  ;;  %v501_v34 = vadd.s32 3, %v176_v44  ;;  %v193_v5 = vand.u32 3, %v176_v44 }
  0x45   :  { %vm298_vm10 = vc.u32 %v273_v8, %v292_v9  ;;  %v297_v57 = vadd.s32 %v292_v9, %v273_v8 }
  0x46   :  { %v837_v22 = vadd.s32 4294967294, %v155_v0  ;;  %v300_v19 = vsel %vm298_vm10, %v299_v17, %v295_v13  ;;  %v502_v4 = vand.u32 3, %v501_v34  ;;  %vm198_vm1 = vcmp.eq.s32.totalorder %v193_v5, 2 }
  0x47   :  { %v301_v23 = vadd.s32 %v300_v19, %v296_v16  ;;  %vm194_vm5 = vcmp.lt.s32.totalorder %v193_v5, 2  ;;  %vm195_vm6 = vcmp.eq.s32.totalorder %v193_v5, 0  ;;  %v788_v5 = vld [vmem:[#allocation2 + $0x70] sm:$0xff] }
  0x48   :  { %vm838_vm11 = vcmp.lt.s32.totalorder %v837_v22, 0  ;;  %vm507_vm0 = vcmp.eq.s32.totalorder %v502_v4, 2  ;;  %vm503_vm2 = vcmp.lt.s32.totalorder %v502_v4, 2  ;;  %vm504_vm4 = vcmp.eq.s32.totalorder %v502_v4, 0 }
  0x49   :  { %v158_v20 = vsel %vm838_vm11, 0, %v837_v22  ;;  %v302_v29 = vadd.s32 536870912, %v301_v23 }
  0x4a   :  { %v159_v24 = vsub.s32 32, %v158_v20  ;;  %v160_v62 = vshll.u32 %v151_v3, %v158_v20  ;;  %v163_v25 = vsub.s32 4294967266, %v158_v20 }
  0x4b   :  { %v1122_v35 = vshrl.u32 %v302_v29, 30 }
  0x4c   :  { %v161_v26 = vshrl.u32 %v143_v18, %v159_v24  ;;  %v164_v28 = vadd.s32 127, %v163_v25 }
  0x4d   :  { %v304_v27 = vshll.u32 %v1122_v35, 30  ;;  %v327_v20 = vsub.s32 4, %v1122_v35 }
  0x4e   :  { %v162_v30 = vor.u32 %v161_v26, %v160_v62  ;;  %v165_v33 = vshll.u32 %v164_v28, 23 }
  0x4f   :  { %v305_v2 = vsub.s32 %v301_v23, %v304_v27  ;;  %v667_v23 = vlaneseq }
  0x50   :  { %v166_v45 = vor.u32 4788187, %v165_v33  ;;  %v169_v36 = vcvt.s32.f32 %v162_v30 }
  0x51   :  { %vm306_vm13 = vcmp.lt.s32.totalorder %v305_v2, 0  ;;  %v307_v41 = vsub.s32 0, %v305_v2 }
  0x52   :  { %v167_v37 = vand.u32 2147483647, %v166_v45 }
  0x53   :  { %v308_v46 = vsel %vm306_vm13, %v307_v41, %v305_v2 }
  0x54   :  { %v170_v7 = vmul.f32 %v169_v36, %v167_v37  ;;  %v309_v38 = vclz %v308_v46 }
  0x56   :  { %v171_v43 = vxor.u32 2147483648, %v170_v7  ;;  %v840_v53 = vadd.s32 4294967294, %v309_v38 }
  0x58   :  { %v172_v47 = vsel %vm51_vm12, %v171_v43, %v170_v7  ;;  %vm841_vm15 = vcmp.lt.s32.totalorder %v840_v53, 0 }
  0x59   :  { %v175_v50 = vsel %vm50_vm14, %v982_v11, %v172_v47  ;;  %v312_v58 = vsel %vm841_vm15, 0, %v840_v53  ;;  %v328_v11 = vsel %vm205_vm3, %v327_v20, %v1122_v35  ;;  %vm346_vm15 = vweird.f32 %v986_v14  ;;  %v774_v20 = vld [vmem:[#allocation2] sm:$0xff] }
  0x5a   :  { %v177_v52 = vmul.f32 %v175_v50, %v175_v50  ;;  %v313_v61 = vsub.s32 32, %v312_v58  ;;  %v314_v12 = vshll.u32 %v305_v2, %v312_v58  ;;  %v317_v56 = vsub.s32 4294967266, %v312_v58 }
  0x5b   :  { %v330_v27 = vsel %vm1136_vm8, 0, %v328_v11 }
  0x5c   :  { %v178_v55 = vmul.f32 -0.001358992, %v177_v52  ;;  %v185_v49 = vmul.f32 -0.00019511016, %v177_v52  ;;  %v315_v54 = vshrl.u32 %v297_v57, %v313_v61  ;;  %v318_v3 = vadd.s32 127, %v317_v56 }
  0x5d   :  { %v656_v41 = vadd.s32 3, %v330_v27  ;;  %v347_v38 = vand.u32 3, %v330_v27 }
  0x5e   :  { %v179_v59 = vadd.f32 0.041655596, %v178_v55  ;;  %v186_v40 = vadd.f32 0.008332121, %v185_v49  ;;  %v316_v42 = vor.u32 %v315_v54, %v314_v12  ;;  %v319_v51 = vshll.u32 %v318_v3, 23 }
  0x5f   :  { %v657_v48 = vand.u32 3, %v656_v41  ;;  %vm352_vm10 = vcmp.eq.s32.totalorder %v347_v38, 2  ;;  %vm349_vm13 = vcmp.eq.s32.totalorder %v347_v38, 0  ;;  %vm348_vm14 = vcmp.lt.s32.totalorder %v347_v38, 2 }
  0x60   :  { %v180_v63 = vmul.f32 %v179_v59, %v177_v52  ;;  %v187_v1 = vmul.f32 %v186_v40, %v177_v52  ;;  %v320_v21 = vor.u32 4788187, %v319_v51  ;;  %v323_v10 = vcvt.s32.f32 %v316_v42  ;;  %v787_v51 = vld [vmem:[#allocation2 + $0x68] sm:$0xff] }
  0x61   :  { %vm662_vm9 = vcmp.eq.s32.totalorder %v657_v48, 2  ;;  %vm658_vm11 = vcmp.lt.s32.totalorder %v657_v48, 2  ;;  %vm659_vm12 = vcmp.eq.s32.totalorder %v657_v48, 0 }
  0x62   :  { %v181_v60 = vadd.f32 -0.4999988, %v180_v63  ;;  %v188_v32 = vadd.f32 -0.16666654, %v187_v1  ;;  %v321_v0 = vand.u32 2147483647, %v320_v21 }
  0x63   :  { %v784_v21 = vld [vmem:[#allocation2 + $0x50] sm:$0xff] }
  0x64   :  { %v182_v6 = vmul.f32 %v181_v60, %v177_v52  ;;  %v189_v9 = vmul.f32 %v188_v32, %v177_v52  ;;  %v324_v22 = vmul.f32 %v323_v10, %v321_v0  ;;  %v783_v10 = vld [vmem:[#allocation2 + $0x48] sm:$0xff]  ;;  %v780_v0 = vld [vmem:[#allocation2 + $0x30] sm:$0xff] }
  0x66   :  { %v183_v31 = vadd.f32 1.0, %v182_v6  ;;  %v190_v8 = vadd.f32 1.0, %v189_v9  ;;  %v325_v24 = vxor.u32 2147483648, %v324_v22  ;;  %v786_v6 = vld [vmem:[#allocation2 + $0x60] sm:$0xff]  ;;  %v785_v9 = vld [vmem:[#allocation2 + $0x58] sm:$0xff] }
  0x68   :  { %v191_v13 = vmul.f32 %v190_v8, %v175_v50  ;;  %v199_v16 = vxor.u32 2147483648, %v183_v31  ;;  %v326_v29 = vsel %vm205_vm3, %v325_v24, %v324_v22  ;;  %v781_v8 = vld [vmem:[#allocation2 + $0x38] sm:$0xff] }
  0x69   :  { %v329_v15 = vsel %vm1136_vm8, %v986_v14, %v326_v29  ;;  %v789_v14 = vld [vmem:[#allocation2 + $0x78] sm:$0xff] }
  0x6a   :  { %v196_v17 = vxor.u32 2147483648, %v191_v13  ;;  %v509_v18 = vsel %vm507_vm0, %v199_v16, %v191_v13  ;;  %v200_v19 = vsel %vm198_vm1, %v199_v16, %v191_v13  ;;  %v331_v36 = vmul.f32 %v329_v15, %v329_v15  ;;  %790 = vmatpush.msra.mxu0 %v789_v14  ;;  %848 = vmatpush.msra.mxu1 %v789_v14  ;;  %v779_v13 = vld [vmem:[#allocation2 + $0x28] sm:$0xff]  ;;  %v778_v16 = vld [vmem:[#allocation2 + $0x20] sm:$0xff]  ;;  %v777_v22 = vld [vmem:[#allocation2 + $0x18] sm:$0xff] }
  0x6c   :  { %v506_v62 = vsel %vm504_vm4, %v183_v31, %v196_v17  ;;  %v197_v25 = vsel %vm195_vm6, %v183_v31, %v196_v17  ;;  %v332_v37 = vmul.f32 -0.001358992, %v331_v36  ;;  %v339_v2 = vmul.f32 -0.00019511016, %v331_v36  ;;  %791 = vmatpush.msra.mxu0 %v788_v5  ;;  %849 = vmatpush.msra.mxu1 %v788_v5  ;;  %v782_v31 = vld [vmem:[#allocation2 + $0x40] sm:$0xff]  ;;  %v776_v17 = vld [vmem:[#allocation2 + $0x10] sm:$0xff] }
  0x6d   :  { %v510_v26 = vsel %vm503_vm2, %v506_v62, %v509_v18  ;;  %v201_v28 = vsel %vm194_vm5, %v197_v25, %v200_v19  ;;  %v775_v18 = vld [vmem:[#allocation2 + $0x8] sm:$0xff]  ;;  %v668_v25 = vand.u32 127, %v667_v23 }
  0x6e   :  { %v511_v30 = vsel %vm192_vm7, nan, %v510_v26  ;;  %v202_v33 = vsel %vm192_vm7, nan, %v201_v28  ;;  %v333_v7 = vadd.f32 0.041655596, %v332_v37  ;;  %v340_v39 = vadd.f32 0.008332121, %v339_v2  ;;  %792 = vmatpush.msra.mxu0 %v787_v51  ;;  %850 = vmatpush.msra.mxu1 %v787_v51 }
  0x6f   :  { %686 = vperm.xlu1 %876, %v511_v30   ;;  %672 = vperm.xlu0 %875, %v202_v33   ;;  %v698_v45 = vmul.f32 %v511_v30, %v511_v30  ;;  %v700_v28 = vshra.s32 %v668_v25, 1  ;;  %v682_v29 = vand.u32 1, %v668_v25  ;;  %v719_v30 = vshra.s32 %v668_v25, 2 }
  0x70   :  { %v334_v43 = vmul.f32 %v333_v7, %v331_v36  ;;  %v341_v46 = vmul.f32 %v340_v39, %v331_v36  ;;  %793 = vmatpush.msra.mxu0 %v786_v6  ;;  %851 = vmatpush.msra.mxu1 %v786_v6  ;;  %vm669_vm1 = vcmp.lt.s32.totalorder %v668_v25, 31  ;;  %v738_v2 = vshra.s32 %v668_v25, 3 }
  0x71   :  { %705 = vperm.xlu2 %877, %v698_v45   ;;  %v717_v54 = vmul.f32 %v698_v45, %v698_v45  ;;  %v701_v33 = vand.u32 1, %v700_v28  ;;  %vm1151_vm0 = vcmp.eq.s32.totalorder %v682_v29, 1 }
  0x72   :  { %v335_v35 = vadd.f32 -0.4999988, %v334_v43  ;;  %v342_v47 = vadd.f32 -0.16666654, %v341_v46  ;;  %794 = vmatpush.msra.mxu0 %v785_v9  ;;  %852 = vmatpush.msra.mxu1 %v785_v9 }
  0x73   :  { %v736_v60 = vmul.f32 %v717_v54, %v717_v54  ;;  %vm702_vm2 = vcmp.eq.s32.totalorder %v701_v33, 1 }
  0x74   :  { %v336_v50 = vmul.f32 %v335_v35, %v331_v36  ;;  %v343_v52 = vmul.f32 %v342_v47, %v331_v36  ;;  %795 = vmatpush.msra.mxu0 %v784_v21  ;;  %853 = vmatpush.msra.mxu1 %v784_v21  ;;  %v720_v36 = vand.u32 1, %v719_v30  ;;  %v739_v35 = vand.u32 1, %v738_v2 }
  0x75   :  { %v755_v42 = vmul.f32 %v736_v60, %v736_v60  ;;  %v757_v47 = vshra.s32 %v668_v25, 4 }
  0x76   :  { %v337_v53 = vadd.f32 1.0, %v336_v50  ;;  %v344_v44 = vadd.f32 1.0, %v343_v52  ;;  %796 = vmatpush.msra.mxu0 %v783_v10  ;;  %854 = vmatpush.msra.mxu1 %v783_v10  ;;  %vm721_vm3 = vcmp.eq.s32.totalorder %v720_v36, 1  ;;  %vm740_vm4 = vcmp.eq.s32.totalorder %v739_v35, 1 }
  0x78   :  { %v345_v55 = vmul.f32 %v344_v44, %v329_v15  ;;  %v353_v49 = vxor.u32 2147483648, %v337_v53  ;;  %797 = vmatpush.msra.mxu0 %v782_v31  ;;  %855 = vmatpush.msra.mxu1 %v782_v31  ;;  %v758_v44 = vand.u32 1, %v757_v47 }
  0x7a   :  { %v350_v57 = vxor.u32 2147483648, %v345_v55  ;;  %v664_v58 = vsel %vm662_vm9, %v353_v49, %v345_v55  ;;  %v354_v59 = vsel %vm352_vm10, %v353_v49, %v345_v55  ;;  %798 = vmatpush.msra.mxu0 %v781_v8  ;;  %856 = vmatpush.msra.mxu1 %v781_v8  ;;  %vm759_vm5 = vcmp.eq.s32.totalorder %v758_v44, 1 }
  0x7c   :  { %v661_v40 = vsel %vm659_vm12, %v337_v53, %v350_v57  ;;  %v351_v61 = vsel %vm349_vm13, %v337_v53, %v350_v57  ;;  %799 = vmatpush.msra.mxu0 %v780_v0  ;;  %857 = vmatpush.msra.mxu1 %v780_v0 }
  0x7d   :  { %v665_v12 = vsel %vm658_vm11, %v661_v40, %v664_v58  ;;  %v355_v34 = vsel %vm348_vm14, %v351_v61, %v354_v59 }
  0x7e   :  { %v666_v56 = vsel %vm346_vm15, nan, %v665_v12  ;;  %v356_v63 = vsel %vm346_vm15, nan, %v355_v34  ;;  %800 = vmatpush.msra.mxu0 %v779_v13  ;;  %858 = vmatpush.msra.mxu1 %v779_v13 }
  0x7f   :  { %v699_v1 = vmul.f32 %v666_v56, %v666_v56  ;;  %691 = vperm.xlu1 %876, %v666_v56   ;;  %677 = vperm.xlu0 %875, %v356_v63  }
  0x80   :  { %801 = vmatpush.msra.mxu0 %v778_v16  ;;  %859 = vmatpush.msra.mxu1 %v778_v16 }
  0x81   :  { %710 = vperm.xlu2 %877, %v699_v1   ;;  %v718_v3 = vmul.f32 %v699_v1, %v699_v1 }
  0x82   :  { %802 = vmatpush.msra.mxu0 %v777_v22  ;;  %860 = vmatpush.msra.mxu1 %v777_v22 }
  0x83   :  { %v737_v32 = vmul.f32 %v718_v3, %v718_v3 }
  0x84   :  { %803 = vmatpush.msra.mxu0 %v776_v17  ;;  %861 = vmatpush.msra.mxu1 %v776_v17 }
  0x85   :  { %v756_v4 = vmul.f32 %v737_v32, %v737_v32 }
  0x86   :  { %804 = vmatpush.msra.mxu0 %v775_v18  ;;  %862 = vmatpush.msra.mxu1 %v775_v18 }
  0x87   :  { %729 = vperm.xlu1 %876, %v718_v3   ;;  %724 = vperm.xlu0 %875, %v717_v54  }
  0x88   :  { %805 = vmatpush.msra.mxu0 %v774_v20  ;;  %863 = vmatpush.msra.mxu1 %v774_v20 }
  0x89   :  { %743 = vperm.xlu2 %877, %v736_v60  }
  0x8f   :  { %762 = vperm.xlu1 %876, %v755_v42   ;;  %748 = vperm.xlu0 %875, %v737_v32  }
  0x91   :  { %767 = vperm.xlu2 %877, %v756_v4  }
  0xcb   :  { %v706_v19 = vpop.permute.xlu2 %705 }
  0xcc   :  { %v713_v41 = vsel %vm702_vm2, %v706_v19, 1.0 }
  0xdb   :  { %v711_v26 = vpop.permute.xlu2 %710 }
  0xdc   :  { %v714_v49 = vsel %vm702_vm2, %v711_v26, 1.0 }
  0xe1   :  { %v687_v24 = vpop.permute.xlu1 %686  ;;  %v673_v62 = vpop.permute.xlu0 %672 }
  0xe2   :  { %v694_v27 = vsel %vm1151_vm0, %v687_v24, 1.0  ;;  %v680_v37 = vsel %vm669_vm1, %v673_v62, 1.0 }
  0xe3   :  { %v744_v7 = vpop.permute.xlu2 %743  ;;  %v696_v39 = vmul.f32 %v694_v27, %v680_v37 }
  0xe4   :  { %v751_v59 = vsel %vm740_vm4, %v744_v7, 1.0 }
  0xe5   :  { %v715_v53 = vmul.f32 %v713_v41, %v696_v39 }
  0xeb   :  { %v768_v40 = vpop.permute.xlu2 %767 }
  0xec   :  { %v771_v60 = vsel %vm759_vm5, %v768_v40, 1.0 }
  0xf1   :  { %v692_v15 = vpop.permute.xlu1 %691  ;;  %v678_v45 = vpop.permute.xlu0 %677 }
  0xf2   :  { %v695_v43 = vsel %vm1151_vm0, %v692_v15, 1.0  ;;  %v681_v46 = vsel %vm669_vm1, %v678_v45, 1.0 }
  0xf3   :  { %v697_v52 = vmul.f32 %v695_v43, %v681_v46 }
  0xf5   :  { %v716_v58 = vmul.f32 %v714_v49, %v697_v52 }
  0xf9   :  { %v730_v48 = vpop.permute.xlu1 %729  ;;  %v725_v38 = vpop.permute.xlu0 %724 }
  0xfa   :  { %v732_v50 = vsel %vm721_vm3, %v725_v38, 1.0  ;;  %v733_v57 = vsel %vm721_vm3, %v730_v48, 1.0 }
  0xfb   :  { %v734_v55 = vmul.f32 %v732_v50, %v715_v53  ;;  %v735_v61 = vmul.f32 %v733_v57, %v716_v58 }
  0xfd   :  { %v753_v56 = vmul.f32 %v751_v59, %v734_v55 }
 0x101   :  { %v763_v12 = vpop.permute.xlu1 %762  ;;  %v749_v34 = vpop.permute.xlu0 %748 }
 0x102   :  { %v770_v63 = vsel %vm759_vm5, %v763_v12, 1.0  ;;  %v752_v1 = vsel %vm740_vm4, %v749_v34, 1.0 }
 0x103   :  { %v754_v54 = vmul.f32 %v752_v1, %v735_v61  ;;  %v772_v3 = vmul.f32 %v770_v63, %v753_v56 }
 0x105   :  { %806 = vmatmul.f32.vlgmr.msra.gmra.mxu0 %v772_v3  ;;  %v773_v32 = vmul.f32 %v771_v60, %v754_v54 }
 0x107   :  { %809 = vmatmul.f32.vlgmr.msra.gmra.mxu1 %v773_v32 }
 0x182   :  { %v807_v42 = vpop.f32.mrf.mxu0 }
 0x183   :  { %813 = vst [vmem:[#allocation5] sm:$0xff] %v807_v42 }
 0x184   :  { %v810_v4 = vpop.f32.mrf.mxu1 }
 0x185   :  { %814 = vst [vmem:[#allocation5 + $0x8] sm:$0xff] %v810_v4 }
 0x186   :  { %827 = dma.vmem_to_hbm [thread:$0]  %s820_s1, 256, %s822_s28, [#allocation4], %s931_s17, %s931_s17, %s932_s18  }
 0x187   :  { %928 = dma.done.wait [#allocation4], 256  }
 0x188   :  { %929 = vsyncadd [#allocation4], 4294967040 }
 0x189   :  { %832 = vsyncpa [#allocation3], 1 }
 0x18a   :  { %833 = vsyncpa [#allocation4], 1 }

</bundles_post_ra>
